<compile_context>
chip_gen: v7x
topology: tpu7x:2x2x1
jax: 0.10.0
libtpu: 0.0.40
codegen_flags: <defaults>
</compile_context>

<pallas_src>
import math

import jax
import jax.numpy as jnp
from jax.experimental import pallas as pl
from jax.experimental.pallas import tpu as pltpu


def _round_up(a, b):
    return (a + b - 1) // b * b


def _gelu(x):
    # TODO(synk): nn.GELU() default is the exact erf form; the tanh
    # approximation is used for guaranteed Mosaic lowering (max dev ~1e-3).
    c = 0.7978845608028654  # sqrt(2/pi)
    return 0.5 * x * (1.0 + jnp.tanh(c * (x + 0.044715 * (x * x * x))))


def _mlp_kernel_eval(x_ref, w1_ref, b1_ref, w2_ref, b2_ref, o_ref):
    h = jnp.dot(x_ref[...], w1_ref[...], preferred_element_type=jnp.float32)
    h = _gelu(h + b1_ref[...])
    h = h.astype(w2_ref.dtype)
    y = jnp.dot(h, w2_ref[...], preferred_element_type=jnp.float32)
    y = y + b2_ref[...]
    o_ref[...] = y.astype(o_ref.dtype)


def _mlp_kernel_train(x_ref, w1_ref, b1_ref, w2_ref, b2_ref,
                      m1_ref, m2_ref, o_ref):
    h = jnp.dot(x_ref[...], w1_ref[...], preferred_element_type=jnp.float32)
    h = _gelu(h + b1_ref[...]) * m1_ref[...]        # dropout1 (pre-scaled mask)
    h = h.astype(w2_ref.dtype)
    y = jnp.dot(h, w2_ref[...], preferred_element_type=jnp.float32)
    y = (y + b2_ref[...]) * m2_ref[...]             # dropout2 (pre-scaled mask)
    o_ref[...] = y.astype(o_ref.dtype)


class MlpBlockPallas:
    """JAX/Pallas equivalent of pytorch_ood.model.vit.MlpBlock."""

    def __init__(self, in_dim, mlp_dim, out_dim, dropout_rate=0.1, key=None,
                 dtype=jnp.float32):
        if key is None:
            key = jax.random.PRNGKey(0)
        k1, k2, k3, k4 = jax.random.split(key, 4)
        bound1 = 1.0 / math.sqrt(in_dim)
        bound2 = 1.0 / math.sqrt(mlp_dim)
        # Stored as (in, out) so the kernel computes x @ W directly.
        self.w1 = jax.random.uniform(k1, (in_dim, mlp_dim), dtype, -bound1, bound1)
        self.b1 = jax.random.uniform(k2, (1, mlp_dim), dtype, -bound1, bound1)
        self.w2 = jax.random.uniform(k3, (mlp_dim, out_dim), dtype, -bound2, bound2)
        self.b2 = jax.random.uniform(k4, (1, out_dim), dtype, -bound2, bound2)
        self.in_dim, self.mlp_dim, self.out_dim = in_dim, mlp_dim, out_dim
        self.dropout_rate = float(dropout_rate)

    # ---- dropout mask generation (torch.nn.Dropout semantics) -------------
    def make_dropout_masks(self, rng, x_shape):
        lead = tuple(x_shape[:-1])
        keep = 1.0 - self.dropout_rate
        k1, k2 = jax.random.split(rng)
        m1 = jax.random.bernoulli(k1, keep, lead + (self.mlp_dim,))
        m2 = jax.random.bernoulli(k2, keep, lead + (self.out_dim,))
        inv = jnp.float32(1.0 / keep)
        return m1.astype(jnp.float32) * inv, m2.astype(jnp.float32) * inv

    # ---- fused Pallas forward ---------------------------------------------
    def forward(self, x, *, dropout_masks=None, block_rows=256):
        assert x.shape[-1] == self.in_dim
        lead = x.shape[:-1]
        M = int(math.prod(lead)) if lead else 1
        x2 = x.reshape(M, self.in_dim)

        # Row-tile: multiple of 8 sublanes, capped so blocks stay well inside
        # scoped VMEM (v7x has only 32 MiB scoped / 64 MiB physical).
        tm = min(int(block_rows), _round_up(M, 8))
        tm = max(8, _round_up(tm, 8))
        M_pad = _round_up(M, tm)
        if M_pad != M:
            x2 = jnp.pad(x2, ((0, M_pad - M), (0, 0)))

        grid = (M_pad // tm,)

        in_specs = [
            pl.BlockSpec((tm, self.in_dim), lambda i: (i, 0)),
            pl.BlockSpec((self.in_dim, self.mlp_dim), lambda i: (0, 0)),
            pl.BlockSpec((1, self.mlp_dim), lambda i: (0, 0)),
            pl.BlockSpec((self.mlp_dim, self.out_dim), lambda i: (0, 0)),
            pl.BlockSpec((1, self.out_dim), lambda i: (0, 0)),
        ]
        args = [x2, self.w1, self.b1, self.w2, self.b2]

        if dropout_masks is not None:
            m1, m2 = dropout_masks
            m1 = m1.reshape(M, self.mlp_dim)
            m2 = m2.reshape(M, self.out_dim)
            if M_pad != M:
                m1 = jnp.pad(m1, ((0, M_pad - M), (0, 0)))
                m2 = jnp.pad(m2, ((0, M_pad - M), (0, 0)))
            in_specs += [
                pl.BlockSpec((tm, self.mlp_dim), lambda i: (i, 0)),
                pl.BlockSpec((tm, self.out_dim), lambda i: (i, 0)),
            ]
            args += [m1, m2]
            kernel = _mlp_kernel_train
        else:
            kernel = _mlp_kernel_eval

        out = pl.pallas_call(
            kernel,
            out_shape=jax.ShapeDtypeStruct((M_pad, self.out_dim), x.dtype),
            grid=grid,
            in_specs=in_specs,
            out_specs=pl.BlockSpec((tm, self.out_dim), lambda i: (i, 0)),
            compiler_params=pltpu.CompilerParams(
                dimension_semantics=("parallel",),
            ),
        )(*args)

        return out[:M].reshape(*lead, self.out_dim)

    def __call__(self, x, *, training=False, rng=None, block_rows=256):
        if training and self.dropout_rate > 0.0:
            assert rng is not None, "training mode needs an rng key"
            masks = self.make_dropout_masks(rng, x.shape)
            return self.forward(x, dropout_masks=masks, block_rows=block_rows)
        return self.forward(x, block_rows=block_rows)

    # ---- pure-JAX reference (same math, no Pallas) -------------------------
    def reference(self, x, dropout_masks=None):
        hp = jax.lax.Precision.HIGHEST
        h = jnp.dot(x.astype(jnp.float32), self.w1.astype(jnp.float32),
                    precision=hp) + self.b1[0]
        h = _gelu(h)
        if dropout_masks is not None:
            h = h * dropout_masks[0]
        h = h.astype(x.dtype)
        y = jnp.dot(h.astype(jnp.float32), self.w2.astype(jnp.float32),
                    precision=hp) + self.b2[0]
        if dropout_masks is not None:
            y = y * dropout_masks[1]
        return y.astype(x.dtype)


if __name__ == "__main__":
    key = jax.random.PRNGKey(0)
    k_params, k_x, k_drop = jax.random.split(key, 3)

    # Small shapes consistent with the module: (batch, seq, in_dim) tokens.
    batch, seq, in_dim, mlp_dim, out_dim = 2, 8, 32, 64, 32
    mlp = MlpBlockPallas(in_dim, mlp_dim, out_dim, dropout_rate=0.1, key=k_params)

    x = jax.random.normal(k_x, (batch, seq, in_dim), dtype=jnp.float32)

    # Eval mode (dropout inactive): check against pure-JAX reference.
    out = mlp(x, training=False)
    out = jax.block_until_ready(out)
    ref = mlp.reference(x)
    assert out.shape == (batch, seq, out_dim)
    assert jnp.allclose(out, ref, atol=1e-2, rtol=1e-2), "eval mismatch vs. reference"

    # Training mode with fixed dropout masks: deterministic numeric check.
    masks = mlp.make_dropout_masks(k_drop, x.shape)
    out_tr = mlp.forward(x, dropout_masks=masks)
    out_tr = jax.block_until_ready(out_tr)
    ref_tr = mlp.reference(x, dropout_masks=masks)
    assert out_tr.shape == (batch, seq, out_dim)
    assert jnp.allclose(out_tr, ref_tr, atol=1e-2, rtol=1e-2), "train mismatch vs. reference"

    # Also exercise the convenience training entry point (fresh masks).
    out_tr2 = jax.block_until_ready(mlp(x, training=True, rng=k_drop))
    assert out_tr2.shape == (batch, seq, out_dim)
    assert bool(jnp.all(jnp.isfinite(out_tr2)))

    print("KERNEL_OK")
</pallas_src>

<mosaic_0001>
module attributes {stable_mosaic.version = 11 : i64} {
  func.func @_mlp_kernel_eval(%arg0: i32, %arg1: memref<16x32xf32, #tpu.memory_space<vmem>>, %arg2: memref<32x64xf32, #tpu.memory_space<vmem>>, %arg3: memref<1x64xf32, #tpu.memory_space<vmem>>, %arg4: memref<64x32xf32, #tpu.memory_space<vmem>>, %arg5: memref<1x32xf32, #tpu.memory_space<vmem>>, %arg6: memref<16x32xf32, #tpu.memory_space<vmem>>) attributes {dimension_semantics = [#tpu.dimension_semantics<parallel>], iteration_bounds = array<i64: 1>, scalar_prefetch = 0 : i64, scratch_operands = 0 : i64, tpu.core_type = #tpu.core_type<tc>, window_params = [{transform_indices = @transform_0, window_bounds = array<i64: 16, 32>}, {pipeline_mode = #tpu.pipeline_mode<synchronous>, transform_indices = @transform_1, window_bounds = array<i64: 32, 64>}, {pipeline_mode = #tpu.pipeline_mode<synchronous>, transform_indices = @transform_2, window_bounds = array<i64: 1, 64>}, {pipeline_mode = #tpu.pipeline_mode<synchronous>, transform_indices = @transform_3, window_bounds = array<i64: 64, 32>}, {pipeline_mode = #tpu.pipeline_mode<synchronous>, transform_indices = @transform_4, window_bounds = array<i64: 1, 32>}, {transform_indices = @transform_5, window_bounds = array<i64: 16, 32>}]} {
    %c0 = arith.constant 0 : index
    %c0_0 = arith.constant 0 : index
    %0 = vector.load %arg1[%c0, %c0_0] : memref<16x32xf32, #tpu.memory_space<vmem>>, vector<16x32xf32>
    %c0_1 = arith.constant 0 : index
    %c0_2 = arith.constant 0 : index
    %1 = vector.load %arg2[%c0_1, %c0_2] : memref<32x64xf32, #tpu.memory_space<vmem>>, vector<32x64xf32>
    %cst = arith.constant dense<0.000000e+00> : vector<16x64xf32>
    %2 = tpu.matmul %0, %1, %cst {dimension_numbers = #tpu.dot_dimension_numbers<[1], [0], [0], [1], [0, 0, 1, 1], [], []>} : vector<16x32xf32>, vector<32x64xf32>, vector<16x64xf32> -> vector<16x64xf32>
    %c0_3 = arith.constant 0 : index
    %c0_4 = arith.constant 0 : index
    %3 = vector.load %arg3[%c0_3, %c0_4] : memref<1x64xf32, #tpu.memory_space<vmem>>, vector<1x64xf32>
    %4 = vector.broadcast %3 : vector<1x64xf32> to vector<16x64xf32>
    %5 = arith.addf %2, %4 : vector<16x64xf32>
    %cst_5 = arith.constant 5.000000e-01 : f32
    %6 = vector.broadcast %cst_5 : f32 to vector<16x64xf32>
    %7 = arith.mulf %6, %5 : vector<16x64xf32>
    %8 = arith.mulf %5, %5 : vector<16x64xf32>
    %9 = arith.mulf %8, %5 : vector<16x64xf32>
    %cst_6 = arith.constant 4.471500e-02 : f32
    %10 = vector.broadcast %cst_6 : f32 to vector<16x64xf32>
    %11 = arith.mulf %10, %9 : vector<16x64xf32>
    %12 = arith.addf %5, %11 : vector<16x64xf32>
    %cst_7 = arith.constant 0.797884583 : f32
    %13 = vector.broadcast %cst_7 : f32 to vector<16x64xf32>
    %14 = arith.mulf %13, %12 : vector<16x64xf32>
    %15 = math.tanh %14 : vector<16x64xf32>
    %cst_8 = arith.constant 1.000000e+00 : f32
    %16 = vector.broadcast %cst_8 : f32 to vector<16x64xf32>
    %17 = arith.addf %16, %15 : vector<16x64xf32>
    %18 = arith.mulf %7, %17 : vector<16x64xf32>
    %c0_9 = arith.constant 0 : index
    %c0_10 = arith.constant 0 : index
    %19 = vector.load %arg4[%c0_9, %c0_10] : memref<64x32xf32, #tpu.memory_space<vmem>>, vector<64x32xf32>
    %cst_11 = arith.constant dense<0.000000e+00> : vector<16x32xf32>
    %20 = tpu.matmul %18, %19, %cst_11 {dimension_numbers = #tpu.dot_dimension_numbers<[1], [0], [0], [1], [0, 0, 1, 1], [], []>} : vector<16x64xf32>, vector<64x32xf32>, vector<16x32xf32> -> vector<16x32xf32>
    %c0_12 = arith.constant 0 : index
    %c0_13 = arith.constant 0 : index
    %21 = vector.load %arg5[%c0_12, %c0_13] : memref<1x32xf32, #tpu.memory_space<vmem>>, vector<1x32xf32>
    %22 = vector.broadcast %21 : vector<1x32xf32> to vector<16x32xf32>
    %23 = arith.addf %20, %22 : vector<16x32xf32>
    %c0_14 = arith.constant 0 : index
    %c0_15 = arith.constant 0 : index
    %24 = vector.load %arg6[%c0_14, %c0_15] : memref<16x32xf32, #tpu.memory_space<vmem>>, vector<16x32xf32>
    tpu.vector_store %arg6[%c0_14, %c0_15], %23 {strides = array<i32>} : memref<16x32xf32, #tpu.memory_space<vmem>>, vector<16x32xf32>,
    return
  }
  func.func @transform_0(%arg0: i32) -> (i32, i32) {
    %c0_i32 = arith.constant 0 : i32
    %c0_i32_0 = arith.constant 0 : i32
    return %arg0, %c0_i32 : i32, i32
  }
  func.func @transform_1(%arg0: i32) -> (i32, i32) {
    %c0_i32 = arith.constant 0 : i32
    %c0_i32_0 = arith.constant 0 : i32
    %c0_i32_1 = arith.constant 0 : i32
    return %c0_i32, %c0_i32_0 : i32, i32
  }
  func.func @transform_2(%arg0: i32) -> (i32, i32) {
    %c0_i32 = arith.constant 0 : i32
    %c0_i32_0 = arith.constant 0 : i32
    %c0_i32_1 = arith.constant 0 : i32
    return %c0_i32, %c0_i32_0 : i32, i32
  }
  func.func @transform_3(%arg0: i32) -> (i32, i32) {
    %c0_i32 = arith.constant 0 : i32
    %c0_i32_0 = arith.constant 0 : i32
    %c0_i32_1 = arith.constant 0 : i32
    return %c0_i32, %c0_i32_0 : i32, i32
  }
  func.func @transform_4(%arg0: i32) -> (i32, i32) {
    %c0_i32 = arith.constant 0 : i32
    %c0_i32_0 = arith.constant 0 : i32
    %c0_i32_1 = arith.constant 0 : i32
    return %c0_i32, %c0_i32_0 : i32, i32
  }
  func.func @transform_5(%arg0: i32) -> (i32, i32) {
    %c0_i32 = arith.constant 0 : i32
    %c0_i32_0 = arith.constant 0 : i32
    return %arg0, %c0_i32 : i32, i32
  }
}

</mosaic_0001>

<bundles_post_ra>
// kernel: tpu_custom_call.1
= control target key start
LH: loop header
LB: loop body
LE: loop exit
PB: predicated region body
PF: predicated region fallthrough
CT: control target
= control target key end

     0   :  { %vm34_vm0 = vcmask 261120   ;;  %s453_s0 = inlined_call_operand.vmem [shape: f32[16,32], index: 0, kind: input, shape index: {}]   ;;  %s454_s1 = inlined_call_operand.vmem [shape: f32[32,64], index: 1, kind: input, shape index: {}]   ;;  %s455_s2 = inlined_call_operand.vmem [shape: f32[1,64], index: 2, kind: input, shape index: {}]   ;;  %s456_s3 = inlined_call_operand.vmem [shape: f32[64,32], index: 3, kind: input, shape index: {}]   ;;  %s457_s4 = inlined_call_operand.vmem [shape: f32[1,32], index: 4, kind: input, shape index: {}]   ;;  %s458_s5 = inlined_call_operand.hbm [shape: f32[16,32], index: 5, kind: output, shape index: {}]  }
   0x1   :  { %v23_v0 = vld [vmem:[%s454_s1] sm:$0xff]  ;;  %v24_v1 = vld [vmem:[%s454_s1 + $0x8] sm:$0xff]  ;;  %v25_v2 = vld [vmem:[%s454_s1 + $0x10] sm:$0xff] }
   0x2   :  { %v301_v3 = vpack.c.bf16 %v24_v1, %v23_v0  ;;  %v26_v4 = vld [vmem:[%s454_s1 + $0x18] sm:$0xff]  ;;  %v21_v5 = vld [vmem:[%s453_s0] sm:$0xff] }
   0x3   :  { %v305_v6 = vpack.c.bf16 %v26_v4, %v25_v2  ;;  %279 = vmatprep.mubr.msk.f32.mxu0 %vm34_vm0, %v21_v5 }
   0x4   :  { %10 = vsyncpa [#allocation3], 0  ;;  %302 = vmatprep.subr.bf16.mxu0 %v301_v3  ;;  %v22_v7 = vld [vmem:[%s453_s0 + $0x8] sm:$0xff]  ;;  %v134_v8 = vld [vmem:[%s456_s3] sm:$0xff]  ;;  %vm149_vm1 = vcmask 523264   ;;  %s356_s21 = smov [#allocation2]  }
   0x5   :  { %304 = vmatpush3.bf16.msra.mxu0 %v301_v3  ;;  %v135_v9 = vld [vmem:[%s456_s3 + $0x8] sm:$0xff]  ;;  %v136_v11 = vld [vmem:[%s456_s3 + $0x10] sm:$0xff]  ;;  %v137_v12 = vld [vmem:[%s456_s3 + $0x18] sm:$0xff]  ;;  %s238_s22 = sshll.u32 %s356_s21, 4  ;;  %s239_s22 = int_to_ptr.vmem [resolvable:$true] %s238_s22 }
   0x6   :  { %306 = vmatprep.subr.bf16.mxu0 %v305_v6  ;;  %v309_v10 = vpack.c.bf16 %v135_v9, %v134_v8  ;;  %v138_v13 = vld [vmem:[%s456_s3 + $0x20] sm:$0xff]  ;;  %v313_v14 = vpack.c.bf16 %v137_v12, %v136_v11  ;;  %v139_v15 = vld [vmem:[%s456_s3 + $0x28] sm:$0xff]  ;;  %v140_v17 = vld [vmem:[%s456_s3 + $0x30] sm:$0xff]  ;;  %s332_s23 = scalar_lea.vmem %s239_s22, 256  ;;  %p337_p1 = scmp.lt.s32.totalorder %s239_s22, %s239_s22 }
   0x7   :  { %v317_v16 = vpack.c.bf16 %v139_v15, %v138_v13  ;;  %v141_v18 = vld [vmem:[%s456_s3 + $0x38] sm:$0xff]  ;;  %v249_v20 = vld [vmem:[%s455_s2] ss:$0 sm:$0xff]  ;;  %p333_p0 = scmp.ne.s32.totalorder %s239_s22, %s332_s23  ;;  %p338_p2 = scmp.lt.s32.totalorder %s332_s23, %s332_s23 }
   0x8   :  { %310 = vmatprep.subr.bf16.mxu1 %v309_v10  ;;  %v321_v19 = vpack.c.bf16 %v141_v18, %v140_v17  ;;  %v252_v43 = vld [vmem:[%s457_s4] ss:$0 sm:$0xff] }
   0x9   :  { %308 = vmatpush3.bf16.msra.mxu0 %v305_v6  ;;  %312 = vmatpush3.bf16.msra.mxu1 %v309_v10  ;;  %p339_p3 = por %p338_p2, %p337_p1 }
   0xa   :  { %314 = vmatprep.subr.bf16.mxu1 %v313_v14 }
   0xb   :  { %p340_p4 = pnand %p339_p3, %p333_p0 }
   0xc   :  { %280 = vmatmul.mubr.msk.f32.vlgmr.msra.gmra.mrb[0].mxu0 %vm34_vm0, %v22_v7 }
   0xd   :  { %316 = vmatpush3.bf16.msra.mxu1 %v313_v14 }
   0xe   :  { %318 = vmatprep.subr.bf16.mxu1 %v317_v16 }
  0x11   :  { %320 = vmatpush3.bf16.msra.mxu1 %v317_v16 }
  0x12   :  { %322 = vmatprep.subr.bf16.mxu1 %v321_v19 }
  0x15   :  { %324 = vmatpush3.bf16.msra.mxu1 %v321_v19 }
  0xdf   :  { %v281_v21 = vpop.f32.mrb[0].mxu0 }
  0xe0   :  { %v113_v22 = vadd.f32 %v281_v21, %v249_v20  ;;  %v107_v23 = vpop.f32.mrb[1].mxu0 }
  0xe1   :  { %v108_v24 = vadd.f32 %v249_v20, %v107_v23 }
  0xe2   :  { %v119_v25 = vmul.f32 %v113_v22, %v113_v22  ;;  %v117_v40 = vmul.f32 0.5, %v113_v22 }
  0xe3   :  { %v118_v26 = vmul.f32 %v108_v24, %v108_v24  ;;  %v116_v38 = vmul.f32 0.5, %v108_v24 }
  0xe4   :  { %v121_v27 = vmul.f32 %v119_v25, %v113_v22 }
  0xe5   :  { %v120_v28 = vmul.f32 %v118_v26, %v108_v24 }
  0xe6   :  { %v123_v29 = vmul.f32 0.044715, %v121_v27 }
  0xe7   :  { %v122_v30 = vmul.f32 0.044715, %v120_v28 }
  0xe8   :  { %v125_v31 = vadd.f32 %v123_v29, %v113_v22 }
  0xe9   :  { %v124_v32 = vadd.f32 %v122_v30, %v108_v24 }
  0xea   :  { %v127_v33 = vmul.f32 0.7978846, %v125_v31 }
  0xeb   :  { %v126_v34 = vmul.f32 0.7978846, %v124_v32 }
  0xec   :  { %328 = vtanh.f32 %v127_v33 }
  0xed   :  { %330 = vtanh.f32 %v126_v34 }
  0xf6   :  { %v329_v35 = vpop.eup %328 }
  0xf7   :  { %v331_v36 = vpop.eup %330  ;;  %v131_v37 = vadd.f32 1.0, %v329_v35 }
  0xf8   :  { %v130_v39 = vadd.f32 1.0, %v331_v36 }
  0xf9   :  { %v133_v42 = vmul.f32 %v131_v37, %v117_v40 }
  0xfa   :  { %v132_v41 = vmul.f32 %v130_v39, %v116_v38 }
  0xfc   :  { %298 = vmatprep.mubr.msk.f32.mxu1 %vm149_vm1, %v132_v41 }
  0xfd   :  { %299 = vmatmul.mubr.msk.f32.vlgmr.msra.gmra.mrb[0].mxu1 %vm149_vm1, %v133_v42 }
 0x1d0   :  { %v300_v44 = vpop.f32.mrb[0].mxu1 }
 0x1d1   :  { %v228_v45 = vadd.f32 %v300_v44, %v252_v43  ;;  %v222_v46 = vpop.f32.mrb[1].mxu1 }
 0x1d2   :  { %v223_v47 = vadd.f32 %v252_v43, %v222_v46 }
 0x1d3   :  { %232 = vst.msk [vmem:[#allocation2 + $0x8] sm:$0xff] %vm34_vm0, %v228_v45 }
 0x1d4   :  { %231 = vst.msk [vmem:[#allocation2] sm:$0xff] %vm34_vm0, %v223_v47 }
 0x1d5   :  { %343 = shalt.err (!%p340_p4)
}
 0x1d6   :  { %s344_s25 = scalar_lea.hbm %s458_s5, 256 }
 0x1d7   :  { %p345_p5 = scmp.ne.s32.totalorder %s458_s5, %s344_s25  ;;  %p348_p6 = scmp.lt.u32.totalorder %s344_s25, %s458_s5 }
 0x1d9   :  { %p350_p7 = pnand %p348_p6, %p345_p5 }
 0x1db   :  { %353 = shalt.err (!%p350_p7)
}
 0x1dc   :  { %s357_s30 = smov 128   ;;  %s358_s1 = smov 8  }
 0x1dd   :  { %244 = dma.vmem_to_hbm [thread:$0]  %s239_s22, 256, %s458_s5, [#allocation3], %s357_s30, %s357_s30, %s358_s1  }
 0x1de   :  { %354 = dma.done.wait [#allocation3], 256  }
 0x1df   :  { %355 = vsyncadd [#allocation3], 4294967040 }
 0x1e0   :  { %248 = vsyncpa [#allocation3], 1 }

</bundles_post_ra>
